<compile_context>
chip_gen: v6e
topology: v6e:2x2x1
jax: 0.10.0
libtpu: 0.0.40
codegen_flags: <defaults>
</compile_context>

<pallas_src>
import jax
import jax.numpy as jnp
from jax.experimental import pallas as pl
from jax.experimental.pallas import tpu as pltpu


def _sap_kernel(x_ref, w1_ref, b1_ref, w2_ref, b2_ref, o_ref):
    # x_ref : (block_b, C, T)   w1_ref: (K, C)   b1_ref: (K, 1)
    # w2_ref: (C, K)            b2_ref: (C, 1)   o_ref : (block_b, C)
    w1 = w1_ref[...].astype(jnp.float32)
    b1 = b1_ref[...].astype(jnp.float32)
    w2 = w2_ref[...].astype(jnp.float32)
    b2 = b2_ref[...].astype(jnp.float32)

    block_b = o_ref.shape[0]
    cols = []
    for i in range(block_b):                       # static unroll, block_b <= 8
        xi = x_ref[i].astype(jnp.float32)          # (C, T)
        # 1x1 conv == matmul over channels (MXU)
        h = jnp.tanh(jnp.dot(w1, xi, preferred_element_type=jnp.float32) + b1)       # (K, T)
        logits = jnp.dot(w2, h, preferred_element_type=jnp.float32) + b2             # (C, T)
        # numerically stable softmax over the time (lane) axis
        m = jnp.max(logits, axis=-1, keepdims=True)                                  # (C, 1)
        e = jnp.exp(logits - m)                                                      # (C, T)
        denom = jnp.sum(e, axis=-1, keepdims=True)                                   # (C, 1)
        alpha = e / denom                                                            # (C, T)
        cols.append(jnp.sum(alpha * xi, axis=-1, keepdims=True))                     # (C, 1)
    out = jnp.concatenate(cols, axis=1)            # (C, block_b)
    # single lane-dense store of the whole output block
    o_ref[...] = jnp.transpose(out, (1, 0)).astype(o_ref.dtype)                      # (block_b, C)


def _pick_block_b(B, C, K, T, in_itemsize):
    # per-row f32 working set inside the kernel:
    #   x (C*T) + h (K*T) + logits/e/alpha (C*T)   plus the input buffer itself
    per_row = (2 * C + K) * T * 4 + C * T * in_itemsize
    budget = 6 * 1024 * 1024            # keeps double-buffered blocks safe on v5e/v6e/v7x
    bb = max(1, min(B, budget // max(per_row, 1), 8))
    if bb >= B:
        return B                        # tiny problem: one grid step over the whole batch
    if bb >= 8:
        bb = (bb // 8) * 8              # sublane-friendly multi-step blocks
    return int(bb)


def self_attentive_pooling(x, w1, b1, w2, b2, *, block_b=None):
    """Self-attentive pooling.

    x : (B, C, T)  features, time last (PyTorch Conv1d layout)
    w1: (K, C), b1: (K,)   squeezed Conv1d(in_dim=C -> K, kernel_size=1) params
    w2: (C, K), b2: (C,)   squeezed Conv1d(K -> in_dim=C, kernel_size=1) params
    returns (B, C)
    """
    B, C, T = x.shape
    K = w1.shape[0]
    if block_b is None:
        block_b = _pick_block_b(B, C, K, T, jnp.dtype(x.dtype).itemsize)
    n_blocks = pl.cdiv(B, block_b)
    Bp = n_blocks * block_b
    if Bp != B:
        # zero padding is numerically safe here (softmax of constant logits, then sum(alpha*0)=0)
        x = jnp.pad(x, ((0, Bp - B), (0, 0), (0, 0)))

    b1_2d = b1.reshape(K, 1)
    b2_2d = b2.reshape(C, 1)

    out = pl.pallas_call(
        _sap_kernel,
        out_shape=jax.ShapeDtypeStruct((Bp, C), x.dtype),
        grid_spec=pltpu.PrefetchScalarGridSpec(
            num_scalar_prefetch=0,
            grid=(n_blocks,),
            in_specs=[
                pl.BlockSpec((block_b, C, T), lambda i: (i, 0, 0)),  # x rows for this step
                pl.BlockSpec((K, C), lambda i: (0, 0)),              # weights stay resident
                pl.BlockSpec((K, 1), lambda i: (0, 0)),
                pl.BlockSpec((C, K), lambda i: (0, 0)),
                pl.BlockSpec((C, 1), lambda i: (0, 0)),
            ],
            out_specs=pl.BlockSpec((block_b, C), lambda i: (i, 0)),
        ),
        compiler_params=pltpu.CompilerParams(
            dimension_semantics=("parallel",),
            vmem_limit_bytes=32 * 1024 * 1024,
        ),
    )(x, w1, b1_2d, w2, b2_2d)
    return out[:B]


def _reference(x, w1, b1, w2, b2):
    xf = x.astype(jnp.float32)
    w1f, b1f = w1.astype(jnp.float32), b1.astype(jnp.float32)
    w2f, b2f = w2.astype(jnp.float32), b2.astype(jnp.float32)
    h = jnp.tanh(jnp.einsum("kc,bct->bkt", w1f, xf) + b1f[None, :, None])
    logits = jnp.einsum("ck,bkt->bct", w2f, h) + b2f[None, :, None]
    alpha = jax.nn.softmax(logits, axis=-1)
    return jnp.sum(alpha * xf, axis=-1).astype(x.dtype)


if __name__ == "__main__":
    key = jax.random.PRNGKey(0)
    B, C, T = 2, 64, 16          # (batch, in_dim, time)
    K = 128                      # bottleneck_dim default
    kx, kw1, kb1, kw2, kb2 = jax.random.split(key, 5)
    x = jax.random.normal(kx, (B, C, T), dtype=jnp.float32)
    w1 = jax.random.normal(kw1, (K, C), dtype=jnp.float32) * (1.0 / jnp.sqrt(C))
    b1 = jax.random.normal(kb1, (K,), dtype=jnp.float32) * 0.1
    w2 = jax.random.normal(kw2, (C, K), dtype=jnp.float32) * (1.0 / jnp.sqrt(K))
    b2 = jax.random.normal(kb2, (C,), dtype=jnp.float32) * 0.1

    out = self_attentive_pooling(x, w1, b1, w2, b2)
    jax.block_until_ready(out)

    ref = _reference(x, w1, b1, w2, b2)
    assert out.shape == (B, C), out.shape
    err = float(jnp.max(jnp.abs(out.astype(jnp.float32) - ref.astype(jnp.float32))))
    assert jnp.allclose(out, ref, atol=1e-4, rtol=1e-4), f"mismatch vs reference, max|diff|={err}"
    print("KERNEL_OK")
</pallas_src>

<mosaic_0001>
module attributes {stable_mosaic.version = 11 : i64} {
  func.func @_sap_kernel(%arg0: i32, %arg1: memref<2x64x16xf32, #tpu.memory_space<vmem>>, %arg2: memref<128x64xf32, #tpu.memory_space<vmem>>, %arg3: memref<128x1xf32, #tpu.memory_space<vmem>>, %arg4: memref<64x128xf32, #tpu.memory_space<vmem>>, %arg5: memref<64x1xf32, #tpu.memory_space<vmem>>, %arg6: memref<2x64xf32, #tpu.memory_space<vmem>>) attributes {dimension_semantics = [#tpu.dimension_semantics<parallel>], iteration_bounds = array<i64: 1>, scalar_prefetch = 0 : i64, scratch_operands = 0 : i64, tpu.core_type = #tpu.core_type<tc>, window_params = [{transform_indices = @transform_0, window_bounds = array<i64: 2, 64, 16>}, {pipeline_mode = #tpu.pipeline_mode<synchronous>, transform_indices = @transform_1, window_bounds = array<i64: 128, 64>}, {pipeline_mode = #tpu.pipeline_mode<synchronous>, transform_indices = @transform_2, window_bounds = array<i64: 128, 1>}, {pipeline_mode = #tpu.pipeline_mode<synchronous>, transform_indices = @transform_3, window_bounds = array<i64: 64, 128>}, {pipeline_mode = #tpu.pipeline_mode<synchronous>, transform_indices = @transform_4, window_bounds = array<i64: 64, 1>}, {transform_indices = @transform_5, window_bounds = array<i64: 2, 64>}]} {
    %c0 = arith.constant 0 : index
    %c0_0 = arith.constant 0 : index
    %0 = vector.load %arg2[%c0, %c0_0] : memref<128x64xf32, #tpu.memory_space<vmem>>, vector<128x64xf32>
    %c0_1 = arith.constant 0 : index
    %c0_2 = arith.constant 0 : index
    %1 = vector.load %arg3[%c0_1, %c0_2] : memref<128x1xf32, #tpu.memory_space<vmem>>, vector<128x1xf32>
    %c0_3 = arith.constant 0 : index
    %c0_4 = arith.constant 0 : index
    %2 = vector.load %arg4[%c0_3, %c0_4] : memref<64x128xf32, #tpu.memory_space<vmem>>, vector<64x128xf32>
    %c0_5 = arith.constant 0 : index
    %c0_6 = arith.constant 0 : index
    %3 = vector.load %arg5[%c0_5, %c0_6] : memref<64x1xf32, #tpu.memory_space<vmem>>, vector<64x1xf32>
    %c0_7 = arith.constant 0 : index
    %c0_8 = arith.constant 0 : index
    %c0_9 = arith.constant 0 : index
    %4 = vector.load %arg1[%c0_7, %c0_8, %c0_9] : memref<2x64x16xf32, #tpu.memory_space<vmem>>, vector<1x64x16xf32>
    %5 = vector.shape_cast %4 : vector<1x64x16xf32> to vector<64x16xf32>
    %cst = arith.constant dense<0.000000e+00> : vector<128x16xf32>
    %6 = tpu.matmul %0, %5, %cst {dimension_numbers = #tpu.dot_dimension_numbers<[1], [0], [0], [1], [0, 0, 1, 1], [], []>} : vector<128x64xf32>, vector<64x16xf32>, vector<128x16xf32> -> vector<128x16xf32>
    %7 = vector.broadcast %1 : vector<128x1xf32> to vector<128x16xf32>
    %8 = arith.addf %6, %7 : vector<128x16xf32>
    %9 = math.tanh %8 : vector<128x16xf32>
    %cst_10 = arith.constant dense<0.000000e+00> : vector<64x16xf32>
    %10 = tpu.matmul %2, %9, %cst_10 {dimension_numbers = #tpu.dot_dimension_numbers<[1], [0], [0], [1], [0, 0, 1, 1], [], []>} : vector<64x128xf32>, vector<128x16xf32>, vector<64x16xf32> -> vector<64x16xf32>
    %11 = vector.broadcast %3 : vector<64x1xf32> to vector<64x16xf32>
    %12 = arith.addf %10, %11 : vector<64x16xf32>
    %cst_11 = arith.constant dense<0xFF800000> : vector<64xf32>
    %13 = vector.multi_reduction <maximumf>, %12, %cst_11 [1] : vector<64x16xf32> to vector<64xf32>
    %14 = vector.shape_cast %13 : vector<64xf32> to vector<64x1xf32>
    %15 = vector.broadcast %14 : vector<64x1xf32> to vector<64x16xf32>
    %16 = arith.subf %12, %15 : vector<64x16xf32>
    %17 = math.exp %16 : vector<64x16xf32>
    %cst_12 = arith.constant dense<0.000000e+00> : vector<64xf32>
    %18 = vector.multi_reduction <add>, %17, %cst_12 [1] : vector<64x16xf32> to vector<64xf32>
    %19 = vector.shape_cast %18 : vector<64xf32> to vector<64x1xf32>
    %20 = vector.broadcast %19 : vector<64x1xf32> to vector<64x16xf32>
    %21 = arith.divf %17, %20 : vector<64x16xf32>
    %22 = arith.mulf %21, %5 : vector<64x16xf32>
    %cst_13 = arith.constant dense<0.000000e+00> : vector<64xf32>
    %23 = vector.multi_reduction <add>, %22, %cst_13 [1] : vector<64x16xf32> to vector<64xf32>
    %24 = vector.shape_cast %23 : vector<64xf32> to vector<64x1xf32>
    %c1 = arith.constant 1 : index
    %c0_14 = arith.constant 0 : index
    %c0_15 = arith.constant 0 : index
    %25 = vector.load %arg1[%c1, %c0_14, %c0_15] : memref<2x64x16xf32, #tpu.memory_space<vmem>>, vector<1x64x16xf32>
    %26 = vector.shape_cast %25 : vector<1x64x16xf32> to vector<64x16xf32>
    %cst_16 = arith.constant dense<0.000000e+00> : vector<128x16xf32>
    %27 = tpu.matmul %0, %26, %cst_16 {dimension_numbers = #tpu.dot_dimension_numbers<[1], [0], [0], [1], [0, 0, 1, 1], [], []>} : vector<128x64xf32>, vector<64x16xf32>, vector<128x16xf32> -> vector<128x16xf32>
    %28 = vector.broadcast %1 : vector<128x1xf32> to vector<128x16xf32>
    %29 = arith.addf %27, %28 : vector<128x16xf32>
    %30 = math.tanh %29 : vector<128x16xf32>
    %cst_17 = arith.constant dense<0.000000e+00> : vector<64x16xf32>
    %31 = tpu.matmul %2, %30, %cst_17 {dimension_numbers = #tpu.dot_dimension_numbers<[1], [0], [0], [1], [0, 0, 1, 1], [], []>} : vector<64x128xf32>, vector<128x16xf32>, vector<64x16xf32> -> vector<64x16xf32>
    %32 = vector.broadcast %3 : vector<64x1xf32> to vector<64x16xf32>
    %33 = arith.addf %31, %32 : vector<64x16xf32>
    %cst_18 = arith.constant dense<0xFF800000> : vector<64xf32>
    %34 = vector.multi_reduction <maximumf>, %33, %cst_18 [1] : vector<64x16xf32> to vector<64xf32>
    %35 = vector.shape_cast %34 : vector<64xf32> to vector<64x1xf32>
    %36 = vector.broadcast %35 : vector<64x1xf32> to vector<64x16xf32>
    %37 = arith.subf %33, %36 : vector<64x16xf32>
    %38 = math.exp %37 : vector<64x16xf32>
    %cst_19 = arith.constant dense<0.000000e+00> : vector<64xf32>
    %39 = vector.multi_reduction <add>, %38, %cst_19 [1] : vector<64x16xf32> to vector<64xf32>
    %40 = vector.shape_cast %39 : vector<64xf32> to vector<64x1xf32>
    %41 = vector.broadcast %40 : vector<64x1xf32> to vector<64x16xf32>
    %42 = arith.divf %38, %41 : vector<64x16xf32>
    %43 = arith.mulf %42, %26 : vector<64x16xf32>
    %cst_20 = arith.constant dense<0.000000e+00> : vector<64xf32>
    %44 = vector.multi_reduction <add>, %43, %cst_20 [1] : vector<64x16xf32> to vector<64xf32>
    %45 = vector.shape_cast %44 : vector<64xf32> to vector<64x1xf32>
    %46 = tpu.concatenate %24, %45 in 1 : vector<64x1xf32>, vector<64x1xf32> -> vector<64x2xf32>
    %47 = tpu.transpose %46, [1, 0] : vector<64x2xf32> -> vector<2x64xf32>
    %c0_21 = arith.constant 0 : index
    %c0_22 = arith.constant 0 : index
    %48 = vector.load %arg6[%c0_21, %c0_22] : memref<2x64xf32, #tpu.memory_space<vmem>>, vector<2x64xf32>
    tpu.vector_store %arg6[%c0_21, %c0_22], %47 {strides = array<i32>} : memref<2x64xf32, #tpu.memory_space<vmem>>, vector<2x64xf32>,
    return
  }
  func.func @transform_0(%arg0: i32) -> (i32, i32, i32) {
    %c0_i32 = arith.constant 0 : i32
    %c0_i32_0 = arith.constant 0 : i32
    %c0_i32_1 = arith.constant 0 : i32
    return %arg0, %c0_i32, %c0_i32_0 : i32, i32, i32
  }
  func.func @transform_1(%arg0: i32) -> (i32, i32) {
    %c0_i32 = arith.constant 0 : i32
    %c0_i32_0 = arith.constant 0 : i32
    %c0_i32_1 = arith.constant 0 : i32
    return %c0_i32, %c0_i32_0 : i32, i32
  }
  func.func @transform_2(%arg0: i32) -> (i32, i32) {
    %c0_i32 = arith.constant 0 : i32
    %c0_i32_0 = arith.constant 0 : i32
    %c0_i32_1 = arith.constant 0 : i32
    return %c0_i32, %c0_i32_0 : i32, i32
  }
  func.func @transform_3(%arg0: i32) -> (i32, i32) {
    %c0_i32 = arith.constant 0 : i32
    %c0_i32_0 = arith.constant 0 : i32
    %c0_i32_1 = arith.constant 0 : i32
    return %c0_i32, %c0_i32_0 : i32, i32
  }
  func.func @transform_4(%arg0: i32) -> (i32, i32) {
    %c0_i32 = arith.constant 0 : i32
    %c0_i32_0 = arith.constant 0 : i32
    %c0_i32_1 = arith.constant 0 : i32
    return %c0_i32, %c0_i32_0 : i32, i32
  }
  func.func @transform_5(%arg0: i32) -> (i32, i32) {
    %c0_i32 = arith.constant 0 : i32
    %c0_i32_0 = arith.constant 0 : i32
    return %arg0, %c0_i32 : i32, i32
  }
}

</mosaic_0001>

<bundles_post_ra>
// kernel: tpu_custom_call.1
= control target key start
LH: loop header
LB: loop body
LE: loop exit
PB: predicated region body
PF: predicated region fallthrough
CT: control target
= control target key end

     0   :  { %vm157_vm0 = vcmask 523264   ;;  %v1560_v2 = vmov 0   ;;  %s2209_s0 = inlined_call_operand.vmem [shape: f32[2,64,16], index: 0, kind: input, shape index: {}]   ;;  %s2210_s1 = inlined_call_operand.vmem [shape: f32[128,64], index: 1, kind: input, shape index: {}]   ;;  %s2211_s2 = inlined_call_operand.vmem [shape: f32[128,1], index: 2, kind: input, shape index: {}]   ;;  %s2212_s3 = inlined_call_operand.vmem [shape: f32[64,128], index: 3, kind: input, shape index: {}]   ;;  %s2213_s4 = inlined_call_operand.vmem [shape: f32[64,1], index: 4, kind: input, shape index: {}]   ;;  %s2214_s5 = inlined_call_operand.hbm [shape: f32[2,64], index: 5, kind: output, shape index: {}]  }
   0x1   :  { %v76_v0 = vld [vmem:[%s2209_s0 + $0x38] sm:$0xff]  ;;  %v75_v1 = vld [vmem:[%s2209_s0 + $0x30] sm:$0xff]  ;;  %1392 = vset.pattern.permute.xlu0 %v1560_v2  ;;  %v74_v3 = vld [vmem:[%s2209_s0 + $0x28] sm:$0xff]  ;;  %1393 = vset.pattern.permute.xlu1 %v1560_v2 }
   0x2   :  { %1221 = vmatprep.subr.mxu0 %v76_v0  ;;  %v1604_v4 = vld [vmem:[%s2210_s1] sm:$0xff]  ;;  %v72_v6 = vld [vmem:[%s2209_s0 + $0x18] sm:$0xff]  ;;  %v71_v7 = vld [vmem:[%s2209_s0 + $0x10] sm:$0xff] }
   0x3   :  { %1222 = vmatpush3.msra.mxu0 %v76_v0  ;;  %1237 = vmatprep.mubr.msk.f32.mxu0 %vm157_vm0, %v1604_v4  ;;  %v73_v5 = vld [vmem:[%s2209_s0 + $0x20] sm:$0xff]  ;;  %v70_v8 = vld [vmem:[%s2209_s0 + $0x8] sm:$0xff]  ;;  %v52_v9 = vld [vmem:[%s2211_s2 + $0x78] sm:$0xff] }
   0x4   :  { %1223 = vmatprep.subr.mxu0 %v75_v1  ;;  %154 = vperm.xlu0 %1392, %v52_v9   ;;  %v50_v10 = vld [vmem:[%s2211_s2 + $0x68] sm:$0xff]  ;;  %v69_v11 = vld [vmem:[%s2209_s0] sm:$0xff]  ;;  %v51_v12 = vld [vmem:[%s2211_s2 + $0x70] sm:$0xff] }
   0x5   :  { %1224 = vmatpush3.msra.mxu0 %v75_v1  ;;  %144 = vperm.xlu1 %1393, %v50_v10   ;;  %v49_v13 = vld [vmem:[%s2211_s2 + $0x60] sm:$0xff]  ;;  %v1638_v14 = vld [vmem:[%s2210_s1 + $0x8] sm:$0xff]  ;;  %v1108_v15 = vld [vmem:[%s2209_s0 + $0x78] sm:$0xff] }
   0x6   :  { %1225 = vmatprep.subr.mxu0 %v74_v3  ;;  %v1646_v16 = vld [vmem:[%s2210_s1 + $0x10] sm:$0xff]  ;;  %v48_v18 = vld [vmem:[%s2211_s2 + $0x58] sm:$0xff]  ;;  %v1106_v21 = vld [vmem:[%s2209_s0 + $0x68] sm:$0xff] }
   0x7   :  { %1226 = vmatpush3.msra.mxu0 %v74_v3  ;;  %v1107_v17 = vld [vmem:[%s2209_s0 + $0x70] sm:$0xff]  ;;  %v1664_v20 = vld [vmem:[%s2210_s1 + $0x18] sm:$0xff] }
   0x8   :  { %1227 = vmatprep.subr.mxu0 %v73_v5  ;;  %149 = vperm.xlu0 %1392, %v51_v12   ;;  %v47_v19 = vld [vmem:[%s2211_s2 + $0x50] sm:$0xff] }
   0x9   :  { %1228 = vmatpush3.msra.mxu0 %v73_v5  ;;  %139 = vperm.xlu1 %1393, %v49_v13  }
   0xa   :  { %1229 = vmatprep.subr.mxu0 %v72_v6 }
   0xb   :  { %1230 = vmatpush3.msra.mxu0 %v72_v6 }
   0xc   :  { %1231 = vmatprep.subr.mxu0 %v71_v7 }
   0xd   :  { %1232 = vmatpush3.msra.mxu0 %v71_v7 }
   0xe   :  { %1233 = vmatprep.subr.mxu0 %v70_v8 }
   0xf   :  { %1234 = vmatpush3.msra.mxu0 %v70_v8 }
  0x10   :  { %1235 = vmatprep.subr.mxu0 %v69_v11 }
  0x11   :  { %1236 = vmatpush3.msra.mxu0 %v69_v11 }
  0x12   :  { %1238 = vmatmul.mubr.msk.f32.vlgmr.msra.gmra.mxu0 %vm157_vm0, %v1638_v14  ;;  %1305 = vmatprep.subr.mxu0 %v1108_v15 }
  0x13   :  { %1306 = vmatpush3.msra.mxu0 %v1108_v15  ;;  %1240 = vmatprep.mubr.msk.f32.mxu0 %vm157_vm0, %v1646_v16 }
  0x14   :  { %10 = vsyncpa [#allocation3], 0  ;;  %1307 = vmatprep.subr.mxu0 %v1107_v17  ;;  %v1672_v22 = vld [vmem:[%s2210_s1 + $0x20] sm:$0xff]  ;;  %134 = vperm.xlu0 %1392, %v48_v18   ;;  %v46_v24 = vld [vmem:[%s2211_s2 + $0x48] sm:$0xff]  ;;  %vm512_vm1 = vcmask 130048   ;;  %vm1028_vm2 = vcmask 7168  }
  0x15   :  { %1308 = vmatpush3.msra.mxu0 %v1107_v17  ;;  %v1105_v23 = vld [vmem:[%s2209_s0 + $0x60] sm:$0xff]  ;;  %129 = vperm.xlu1 %1393, %v47_v19   ;;  %v1690_v26 = vld [vmem:[%s2210_s1 + $0x28] sm:$0xff]  ;;  %v1104_v27 = vld [vmem:[%s2209_s0 + $0x58] sm:$0xff]  ;;  %vm1069_vm3 = vcmask 517120  }
  0x16   :  { %1241 = vmatmul.mubr.msk.f32.gmra.mxu0 %vm157_vm0, %v1664_v20  ;;  %1309 = vmatprep.subr.mxu0 %v1106_v21  ;;  %v45_v25 = vld [vmem:[%s2211_s2 + $0x40] sm:$0xff]  ;;  %v1698_v28 = vld [vmem:[%s2210_s1 + $0x30] sm:$0xff]  ;;  %v44_v30 = vld [vmem:[%s2211_s2 + $0x38] sm:$0xff] }
  0x17   :  { %1243 = vmatprep.mubr.msk.f32.mxu0 %vm157_vm0, %v1672_v22  ;;  %1310 = vmatpush3.msra.mxu0 %v1106_v21  ;;  %v1103_v29 = vld [vmem:[%s2209_s0 + $0x50] sm:$0xff]  ;;  %v1716_v32 = vld [vmem:[%s2210_s1 + $0x38] sm:$0xff]  ;;  %v1102_v33 = vld [vmem:[%s2209_s0 + $0x48] sm:$0xff] }
  0x18   :  { %1311 = vmatprep.subr.mxu0 %v1105_v23  ;;  %124 = vperm.xlu0 %1392, %v46_v24   ;;  %v43_v31 = vld [vmem:[%s2211_s2 + $0x30] sm:$0xff]  ;;  %v29_v34 = vld [vmem:[%s2210_s1 + $0x40] sm:$0xff]  ;;  %v42_v36 = vld [vmem:[%s2211_s2 + $0x28] sm:$0xff] }
  0x19   :  { %1312 = vmatpush3.msra.mxu0 %v1105_v23  ;;  %119 = vperm.xlu1 %1393, %v45_v25   ;;  %v1101_v35 = vld [vmem:[%s2209_s0 + $0x40] sm:$0xff]  ;;  %v30_v38 = vld [vmem:[%s2210_s1 + $0x48] sm:$0xff]  ;;  %v31_v39 = vld [vmem:[%s2210_s1 + $0x50] sm:$0xff] }
  0x1a   :  { %1244 = vmatmul.mubr.msk.f32.gmra.mxu0 %vm157_vm0, %v1690_v26  ;;  %1313 = vmatprep.subr.mxu0 %v1104_v27  ;;  %v41_v37 = vld [vmem:[%s2211_s2 + $0x20] sm:$0xff]  ;;  %v40_v40 = vld [vmem:[%s2211_s2 + $0x18] sm:$0xff]  ;;  %v39_v41 = vld [vmem:[%s2211_s2 + $0x10] sm:$0xff] }
  0x1b   :  { %1246 = vmatprep.mubr.msk.f32.mxu0 %vm157_vm0, %v1698_v28  ;;  %1314 = vmatpush3.msra.mxu0 %v1104_v27  ;;  %v32_v42 = vld [vmem:[%s2210_s1 + $0x58] sm:$0xff]  ;;  %v33_v43 = vld [vmem:[%s2210_s1 + $0x60] sm:$0xff]  ;;  %v38_v44 = vld [vmem:[%s2211_s2 + $0x8] sm:$0xff] }
  0x1c   :  { %1315 = vmatprep.subr.mxu0 %v1103_v29  ;;  %114 = vperm.xlu0 %1392, %v44_v30   ;;  %v37_v45 = vld [vmem:[%s2211_s2] sm:$0xff]  ;;  %v34_v46 = vld [vmem:[%s2210_s1 + $0x68] sm:$0xff]  ;;  %v35_v47 = vld [vmem:[%s2210_s1 + $0x70] sm:$0xff] }
  0x1d   :  { %1316 = vmatpush3.msra.mxu0 %v1103_v29  ;;  %109 = vperm.xlu1 %1393, %v43_v31   ;;  %v61_v48 = vld [vmem:[%s2213_s4] sm:$0xff]  ;;  %v62_v49 = vld [vmem:[%s2213_s4 + $0x8] sm:$0xff]  ;;  %v36_v50 = vld [vmem:[%s2210_s1 + $0x78] sm:$0xff] }
  0x1e   :  { %1247 = vmatmul.mubr.msk.f32.gmra.mxu0 %vm157_vm0, %v1716_v32  ;;  %1317 = vmatprep.subr.mxu0 %v1102_v33  ;;  %v63_v51 = vld [vmem:[%s2213_s4 + $0x10] sm:$0xff]  ;;  %v64_v52 = vld [vmem:[%s2213_s4 + $0x18] sm:$0xff]  ;;  %v65_v53 = vld [vmem:[%s2213_s4 + $0x20] sm:$0xff] }
  0x1f   :  { %1249 = vmatprep.mubr.msk.f32.mxu0 %vm157_vm0, %v29_v34  ;;  %1318 = vmatpush3.msra.mxu0 %v1102_v33  ;;  %v66_v54 = vld [vmem:[%s2213_s4 + $0x28] sm:$0xff]  ;;  %v67_v55 = vld [vmem:[%s2213_s4 + $0x30] sm:$0xff]  ;;  %v68_v56 = vld [vmem:[%s2213_s4 + $0x38] sm:$0xff] }
  0x20   :  { %1319 = vmatprep.subr.mxu0 %v1101_v35  ;;  %104 = vperm.xlu0 %1392, %v42_v36   ;;  %v1827_v57 = vld [vmem:[%s2212_s3] sm:$0xff] }
  0x21   :  { %1320 = vmatpush3.msra.mxu0 %v1101_v35  ;;  %99 = vperm.xlu1 %1393, %v41_v37  }
  0x22   :  { %1250 = vmatmul.mubr.msk.f32.gmra.mxu0 %vm157_vm0, %v30_v38  ;;  %1293 = vmatprep.mubr.f32.mxu1 %v1827_v57 }
  0x23   :  { %1252 = vmatprep.mubr.msk.f32.mxu0 %vm157_vm0, %v31_v39 }
  0x24   :  { %94 = vperm.xlu0 %1392, %v40_v40  }
  0x25   :  { %89 = vperm.xlu1 %1393, %v39_v41  }
  0x26   :  { %1253 = vmatmul.mubr.msk.f32.gmra.mxu0 %vm157_vm0, %v32_v42 }
  0x27   :  { %1255 = vmatprep.mubr.msk.f32.mxu0 %vm157_vm0, %v33_v43 }
  0x28   :  { %84 = vperm.xlu0 %1392, %v38_v44  }
  0x29   :  { %79 = vperm.xlu1 %1393, %v37_v45  }
  0x2a   :  { %1256 = vmatmul.mubr.msk.f32.gmra.mxu0 %vm157_vm0, %v34_v46 }
  0x2b   :  { %1258 = vmatprep.mubr.msk.f32.mxu0 %vm157_vm0, %v35_v47 }
  0x2c   :  { %369 = vperm.xlu0 %1392, %v61_v48  }
  0x2d   :  { %374 = vperm.xlu1 %1393, %v62_v49  }
  0x2e   :  { %1259 = vmatmul.mubr.msk.f32.gmra.mxu0 %vm157_vm0, %v36_v50 }
  0x2f   :  { %1321 = vmatprep.mubr.msk.f32.mxu0 %vm157_vm0, %v1604_v4 }
  0x30   :  { %379 = vperm.xlu0 %1392, %v63_v51  }
  0x31   :  { %384 = vperm.xlu1 %1393, %v64_v52  }
  0x32   :  { %1322 = vmatmul.mubr.msk.f32.vlgmr.msra.gmra.mxu0 %vm157_vm0, %v1638_v14 }
  0x33   :  { %1324 = vmatprep.mubr.msk.f32.mxu0 %vm157_vm0, %v1646_v16 }
  0x34   :  { %389 = vperm.xlu0 %1392, %v65_v53  }
  0x35   :  { %394 = vperm.xlu1 %1393, %v66_v54  }
  0x36   :  { %1325 = vmatmul.mubr.msk.f32.gmra.mxu0 %vm157_vm0, %v1664_v20 }
  0x37   :  { %1327 = vmatprep.mubr.msk.f32.mxu0 %vm157_vm0, %v1672_v22 }
  0x38   :  { %399 = vperm.xlu0 %1392, %v67_v55  }
  0x39   :  { %404 = vperm.xlu1 %1393, %v68_v56  }
  0x3a   :  { %1328 = vmatmul.mubr.msk.f32.gmra.mxu0 %vm157_vm0, %v1690_v26 }
  0x3b   :  { %1330 = vmatprep.mubr.msk.f32.mxu0 %vm157_vm0, %v1698_v28 }
  0x3e   :  { %1331 = vmatmul.mubr.msk.f32.gmra.mxu0 %vm157_vm0, %v1716_v32 }
  0x3f   :  { %1333 = vmatprep.mubr.msk.f32.mxu0 %vm157_vm0, %v29_v34 }
  0x42   :  { %1334 = vmatmul.mubr.msk.f32.gmra.mxu0 %vm157_vm0, %v30_v38 }
  0x43   :  { %1336 = vmatprep.mubr.msk.f32.mxu0 %vm157_vm0, %v31_v39 }
  0x46   :  { %1337 = vmatmul.mubr.msk.f32.gmra.mxu0 %vm157_vm0, %v32_v42 }
  0x47   :  { %1339 = vmatprep.mubr.msk.f32.mxu0 %vm157_vm0, %v33_v43 }
  0x4a   :  { %1340 = vmatmul.mubr.msk.f32.gmra.mxu0 %vm157_vm0, %v34_v46 }
  0x4b   :  { %1342 = vmatprep.mubr.msk.f32.mxu0 %vm157_vm0, %v35_v47 }
  0x4e   :  { %1343 = vmatmul.mubr.msk.f32.gmra.mxu0 %vm157_vm0, %v36_v50 }
  0x7f   :  { %v1838_v63 = vpop.permute.xlu0 %154 }
  0x80   :  { %v1840_v1 = vpop.permute.xlu1 %144 }
  0x83   :  { %v1842_v4 = vpop.permute.xlu0 %149 }
  0x84   :  { %v1844_v6 = vpop.permute.xlu1 %139 }
  0x8f   :  { %v1846_v9 = vpop.permute.xlu0 %134 }
  0x90   :  { %v1848_v11 = vpop.permute.xlu1 %129 }
  0x93   :  { %v1850_v14 = vpop.permute.xlu0 %124 }
  0x94   :  { %v1853_v17 = vpop.permute.xlu1 %119 }
  0x97   :  { %v1860_v23 = vpop.permute.xlu0 %114 }
  0x98   :  { %v1865_v26 = vpop.permute.xlu1 %109 }
  0x9b   :  { %v1873_v31 = vpop.permute.xlu0 %104 }
  0x9c   :  { %v1878_v34 = vpop.permute.xlu1 %99 }
  0x9f   :  { %v1886_v41 = vpop.permute.xlu0 %94 }
  0xa0   :  { %v1891_v45 = vpop.permute.xlu1 %89 }
  0xa3   :  { %v1900_v52 = vpop.permute.xlu0 %84 }
  0xa4   :  { %v1904_v56 = vpop.permute.xlu1 %79 }
  0xd2   :  { %v1830_v58 = vpop.f32.mrf.mxu0 }
  0xd4   :  { %v1832_v59 = vpop.f32.mrf.mxu0 }
  0xd6   :  { %v1834_v60 = vpop.f32.mrf.mxu0 }
  0xd7   :  { %v288_v50 = vadd.f32 %v1834_v60, %v1886_v41  ;;  %v278_v60 = vadd.f32 %v1830_v58, %v1900_v52 }
  0xd8   :  { %v1836_v61 = vpop.f32.mrf.mxu0 }
  0xd9   :  { %v283_v54 = vadd.f32 %v1836_v61, %v1891_v45 }
  0xda   :  { %v1245_v62 = vpop.f32.mrf.mxu0 }
  0xdb   :  { %v298_v43 = vadd.f32 %v1245_v62, %v1873_v31 }
  0xdc   :  { %v292_v0 = vpop.f32.mrf.mxu0 }
  0xdd   :  { %v293_v47 = vadd.f32 %v292_v0, %v1878_v34 }
  0xde   :  { %v1248_v2 = vpop.f32.mrf.mxu0 }
  0xdf   :  { %v308_v36 = vadd.f32 %v1248_v2, %v1860_v23 }
  0xe0   :  { %v302_v3 = vpop.f32.mrf.mxu0 }
  0xe1   :  { %v303_v39 = vadd.f32 %v302_v3, %v1865_v26  ;;  %v273_v3 = vadd.f32 %v1832_v59, %v1904_v56 }
  0xe2   :  { %v1251_v5 = vpop.f32.mrf.mxu0 }
  0xe3   :  { %v318_v30 = vadd.f32 %v1251_v5, %v1850_v14 }
  0xe4   :  { %v312_v7 = vpop.f32.mrf.mxu0 }
  0xe5   :  { %v313_v33 = vadd.f32 %v312_v7, %v1853_v17 }
  0xe6   :  { %v1254_v8 = vpop.f32.mrf.mxu0 }
  0xe7   :  { %v328_v25 = vadd.f32 %v1254_v8, %v1846_v9 }
  0xe8   :  { %v322_v10 = vpop.f32.mrf.mxu0 }
  0xe9   :  { %v323_v28 = vadd.f32 %v322_v10, %v1848_v11 }
  0xea   :  { %v1257_v12 = vpop.f32.mrf.mxu0 }
  0xeb   :  { %v338_v19 = vadd.f32 %v1257_v12, %v1840_v1 }
  0xec   :  { %v332_v13 = vpop.f32.mrf.mxu0 }
  0xed   :  { %v333_v22 = vadd.f32 %v332_v13, %v1844_v6 }
  0xee   :  { %v1260_v15 = vpop.f32.mrf.mxu0 }
  0xef   :  { %v348_v16 = vadd.f32 %v1260_v15, %v1838_v63 }
  0xf0   :  { %v342_v18 = vpop.f32.mrf.mxu0 }
  0xf1   :  { %1394 = vtanh.f32 %v348_v16  ;;  %v343_v20 = vadd.f32 %v342_v18, %v1842_v4 }
  0xf2   :  { %v1857_v21 = vpop.f32.mrf.mxu0 }
  0xf3   :  { %1396 = vtanh.f32 %v343_v20 }
  0xf4   :  { %v1862_v24 = vpop.f32.mrf.mxu0  ;;  %1398 = vtanh.f32 %v338_v19 }
  0xf5   :  { %1400 = vtanh.f32 %v333_v22 }
  0xf6   :  { %v1867_v27 = vpop.f32.mrf.mxu0  ;;  %1402 = vtanh.f32 %v328_v25 }
  0xf7   :  { %1404 = vtanh.f32 %v323_v28 }
  0xf8   :  { %v1870_v29 = vpop.f32.mrf.mxu0  ;;  %1406 = vtanh.f32 %v318_v30 }
  0xf9   :  { %1408 = vtanh.f32 %v313_v33 }
  0xfa   :  { %v1875_v32 = vpop.f32.mrf.mxu0  ;;  %1410 = vtanh.f32 %v308_v36 }
  0xfb   :  { %1412 = vtanh.f32 %v303_v39  ;;  %v734_v33 = vadd.f32 %v1875_v32, %v1873_v31  ;;  %v58_v31 = vld [vmem:[%s2212_s3 + $0x28] sm:$0xff]  ;;  %v724_v32 = vadd.f32 %v1867_v27, %v1886_v41  ;;  %v719_v39 = vadd.f32 %v1870_v29, %v1891_v45  ;;  %v60_v27 = vld [vmem:[%s2212_s3 + $0x38] sm:$0xff] }
  0xfc   :  { %v1880_v35 = vpop.f32.mrf.mxu0  ;;  %1414 = vtanh.f32 %v298_v43  ;;  %v714_v41 = vadd.f32 %v1857_v21, %v1900_v52  ;;  %v709_v29 = vadd.f32 %v1862_v24, %v1904_v56 }
  0xfd   :  { %1416 = vtanh.f32 %v293_v47 }
  0xfe   :  { %v1395_v37 = vpop.eup %1394  ;;  %v1883_v38 = vpop.f32.mrf.mxu0  ;;  %1418 = vtanh.f32 %v288_v50 }
  0xff   :  { %1261 = vmatprep.subr.mxu1 %v1395_v37  ;;  %1420 = vtanh.f32 %v283_v54  ;;  %v744_v25 = vadd.f32 %v1883_v38, %v1860_v23  ;;  %v1939_v23 = vld [vmem:[%s2212_s3 + $0x18] sm:$0xff]  ;;  %v370_v50 = vpop.permute.xlu0 %369 }
 0x100   :  { %v1397_v40 = vpop.eup %1396  ;;  %1262 = vmatpush3.msra.mxu1 %v1395_v37  ;;  %v1888_v42 = vpop.f32.mrf.mxu0  ;;  %1422 = vtanh.f32 %v278_v60  ;;  %v729_v37 = vadd.f32 %v1880_v35, %v1878_v34  ;;  %v59_v34 = vld [vmem:[%s2212_s3 + $0x30] sm:$0xff] }
 0x101   :  { %1263 = vmatprep.subr.mxu1 %v1397_v40  ;;  %v1399_v44 = vpop.eup %1398  ;;  %1424 = vtanh.f32 %v273_v3  ;;  %v739_v28 = vadd.f32 %v1888_v42, %v1865_v26  ;;  %v1946_v26 = vld [vmem:[%s2212_s3 + $0x20] sm:$0xff] }
 0x102   :  { %1264 = vmatpush3.msra.mxu1 %v1397_v40  ;;  %v1893_v46 = vpop.f32.mrf.mxu0  ;;  %v1401_v48 = vpop.eup %1400 }
 0x103   :  { %1265 = vmatprep.subr.mxu1 %v1399_v44  ;;  %v1403_v51 = vpop.eup %1402  ;;  %v754_v20 = vadd.f32 %v1893_v46, %v1850_v14  ;;  %v1930_v14 = vld [vmem:[%s2212_s3 + $0x10] sm:$0xff] }
 0x104   :  { %1266 = vmatpush3.msra.mxu1 %v1399_v44  ;;  %v1896_v49 = vpop.f32.mrf.mxu0  ;;  %v1405_v55 = vpop.eup %1404 }
 0x105   :  { %1267 = vmatprep.subr.mxu1 %v1401_v48  ;;  %v1407_v0 = vpop.eup %1406 }
 0x106   :  { %1268 = vmatpush3.msra.mxu1 %v1401_v48  ;;  %v1338_v53 = vpop.f32.mrf.mxu0  ;;  %v1409_v61 = vpop.eup %1408 }
 0x107   :  { %1269 = vmatprep.subr.mxu1 %v1403_v51  ;;  %v1411_v7 = vpop.eup %1410 }
 0x108   :  { %1270 = vmatpush3.msra.mxu1 %v1403_v51  ;;  %v758_v62 = vpop.f32.mrf.mxu0  ;;  %v1413_v10 = vpop.eup %1412 }
 0x109   :  { %1271 = vmatprep.subr.mxu1 %v1405_v55  ;;  %v1415_v15 = vpop.eup %1414 }
 0x10a   :  { %1272 = vmatpush3.msra.mxu1 %v1405_v55  ;;  %v1341_v2 = vpop.f32.mrf.mxu0  ;;  %v1417_v18 = vpop.eup %1416 }
 0x10b   :  { %1273 = vmatprep.subr.mxu1 %v1407_v0  ;;  %v774_v13 = vadd.f32 %v1341_v2, %v1840_v1  ;;  %v1419_v19 = vpop.eup %1418  ;;  %v759_v1 = vadd.f32 %v758_v62, %v1848_v11  ;;  %v1923_v11 = vld [vmem:[%s2212_s3 + $0x8] sm:$0xff] }
 0x10c   :  { %1274 = vmatpush3.msra.mxu1 %v1407_v0  ;;  %v768_v5 = vpop.f32.mrf.mxu0  ;;  %v380_v0 = vpop.permute.xlu0 %379 }
 0x10d   :  { %1275 = vmatprep.subr.mxu1 %v1409_v61  ;;  %v769_v16 = vadd.f32 %v768_v5, %v1844_v6 }
 0x10e   :  { %1276 = vmatpush3.msra.mxu1 %v1409_v61  ;;  %v1344_v8 = vpop.f32.mrf.mxu0 }
 0x10f   :  { %v784_v58 = vadd.f32 %v1344_v8, %v1838_v63  ;;  %1277 = vmatprep.subr.mxu1 %v1411_v7  ;;  %v764_v63 = vadd.f32 %v1338_v53, %v1846_v9  ;;  %v749_v9 = vadd.f32 %v1896_v49, %v1853_v17  ;;  %v375_v49 = vpop.permute.xlu1 %374 }
 0x110   :  { %1278 = vmatpush3.msra.mxu1 %v1411_v7  ;;  %v778_v12 = vpop.f32.mrf.mxu0 }
 0x111   :  { %1426 = vtanh.f32 %v784_v58  ;;  %v779_v59 = vadd.f32 %v778_v12, %v1842_v4  ;;  %1279 = vmatprep.subr.mxu1 %v1413_v10  ;;  %v1421_v4 = vpop.eup %1420 }
 0x112   :  { %1280 = vmatpush3.msra.mxu1 %v1413_v10  ;;  %v1423_v6 = vpop.eup %1422 }
 0x113   :  { %1428 = vtanh.f32 %v779_v59  ;;  %1281 = vmatprep.subr.mxu1 %v1415_v15  ;;  %v1425_v22 = vpop.eup %1424  ;;  %v385_v56 = vpop.permute.xlu1 %384 }
 0x114   :  { %1282 = vmatpush3.msra.mxu1 %v1415_v15  ;;  %1430 = vtanh.f32 %v774_v13 }
 0x115   :  { %1283 = vmatprep.subr.mxu1 %v1417_v18  ;;  %1432 = vtanh.f32 %v769_v16 }
 0x116   :  { %1284 = vmatpush3.msra.mxu1 %v1417_v18  ;;  %1434 = vtanh.f32 %v764_v63  ;;  %v390_v63 = vpop.permute.xlu0 %389 }
 0x117   :  { %1285 = vmatprep.subr.mxu1 %v1419_v19  ;;  %1436 = vtanh.f32 %v759_v1 }
 0x118   :  { %1286 = vmatpush3.msra.mxu1 %v1419_v19  ;;  %1438 = vtanh.f32 %v754_v20 }
 0x119   :  { %1287 = vmatprep.subr.mxu1 %v1421_v4  ;;  %1440 = vtanh.f32 %v749_v9 }
 0x11a   :  { %1288 = vmatpush3.msra.mxu1 %v1421_v4  ;;  %1442 = vtanh.f32 %v744_v25 }
 0x11b   :  { %1289 = vmatprep.subr.mxu1 %v1423_v6  ;;  %1444 = vtanh.f32 %v739_v28 }
 0x11c   :  { %1290 = vmatpush3.msra.mxu1 %v1423_v6  ;;  %1446 = vtanh.f32 %v734_v33  ;;  %v400_v33 = vpop.permute.xlu0 %399 }
 0x11d   :  { %1291 = vmatprep.subr.mxu1 %v1425_v22  ;;  %1448 = vtanh.f32 %v729_v37 }
 0x11e   :  { %v1427_v17 = vpop.eup %1426  ;;  %1292 = vmatpush3.msra.mxu1 %v1425_v22  ;;  %1450 = vtanh.f32 %v724_v32 }
 0x11f   :  { %1294 = vmatmul.mubr.f32.vlgmr.msra.gmra.mxu1 %v1923_v11  ;;  %1345 = vmatprep.subr.mxu1 %v1427_v17  ;;  %1452 = vtanh.f32 %v719_v39 }
 0x120   :  { %v1429_v30 = vpop.eup %1428  ;;  %1346 = vmatpush3.msra.mxu1 %v1427_v17  ;;  %1296 = vmatprep.mubr.f32.mxu1 %v1930_v14  ;;  %1454 = vtanh.f32 %v714_v41 }
 0x121   :  { %1347 = vmatprep.subr.mxu1 %v1429_v30  ;;  %v1431_v36 = vpop.eup %1430  ;;  %1456 = vtanh.f32 %v709_v29 }
 0x122   :  { %1348 = vmatpush3.msra.mxu1 %v1429_v30  ;;  %v1433_v38 = vpop.eup %1432 }
 0x123   :  { %1297 = vmatmul.mubr.f32.gmra.mxu1 %v1939_v23  ;;  %1349 = vmatprep.subr.mxu1 %v1431_v36  ;;  %v1435_v35 = vpop.eup %1434 }
 0x124   :  { %1350 = vmatpush3.msra.mxu1 %v1431_v36  ;;  %1299 = vmatprep.mubr.f32.mxu1 %v1946_v26  ;;  %v1437_v40 = vpop.eup %1436 }
 0x125   :  { %1351 = vmatprep.subr.mxu1 %v1433_v38  ;;  %v1439_v42 = vpop.eup %1438 }
 0x126   :  { %1352 = vmatpush3.msra.mxu1 %v1433_v38  ;;  %v1441_v43 = vpop.eup %1440 }
 0x127   :  { %1300 = vmatmul.mubr.f32.gmra.mxu1 %v58_v31  ;;  %1353 = vmatprep.subr.mxu1 %v1435_v35  ;;  %v1443_v44 = vpop.eup %1442 }
 0x128   :  { %1354 = vmatpush3.msra.mxu1 %v1435_v35  ;;  %1302 = vmatprep.mubr.f32.mxu1 %v59_v34  ;;  %v1445_v21 = vpop.eup %1444 }
 0x129   :  { %1355 = vmatprep.subr.mxu1 %v1437_v40  ;;  %v1447_v45 = vpop.eup %1446 }
 0x12a   :  { %1356 = vmatpush3.msra.mxu1 %v1437_v40  ;;  %v1449_v24 = vpop.eup %1448 }
 0x12b   :  { %1303 = vmatmul.mubr.f32.gmra.mxu1 %v60_v27  ;;  %1357 = vmatprep.subr.mxu1 %v1439_v42  ;;  %v1451_v46 = vpop.eup %1450 }
 0x12c   :  { %1358 = vmatpush3.msra.mxu1 %v1439_v42  ;;  %1377 = vmatprep.mubr.f32.mxu1 %v1827_v57  ;;  %v1453_v47 = vpop.eup %1452 }
 0x12d   :  { %1359 = vmatprep.subr.mxu1 %v1441_v43  ;;  %v1455_v57 = vpop.eup %1454 }
 0x12e   :  { %1360 = vmatpush3.msra.mxu1 %v1441_v43  ;;  %v1457_v48 = vpop.eup %1456 }
 0x12f   :  { %1361 = vmatprep.subr.mxu1 %v1443_v44 }
 0x130   :  { %1362 = vmatpush3.msra.mxu1 %v1443_v44 }
 0x131   :  { %1363 = vmatprep.subr.mxu1 %v1445_v21 }
 0x132   :  { %1364 = vmatpush3.msra.mxu1 %v1445_v21 }
 0x133   :  { %1365 = vmatprep.subr.mxu1 %v1447_v45 }
 0x134   :  { %1366 = vmatpush3.msra.mxu1 %v1447_v45 }
 0x135   :  { %1367 = vmatprep.subr.mxu1 %v1449_v24 }
 0x136   :  { %1368 = vmatpush3.msra.mxu1 %v1449_v24 }
 0x137   :  { %1369 = vmatprep.subr.mxu1 %v1451_v46 }
 0x138   :  { %1370 = vmatpush3.msra.mxu1 %v1451_v46 }
 0x139   :  { %1371 = vmatprep.subr.mxu1 %v1453_v47 }
 0x13a   :  { %1372 = vmatpush3.msra.mxu1 %v1453_v47 }
 0x13b   :  { %1373 = vmatprep.subr.mxu1 %v1455_v57 }
 0x13c   :  { %1374 = vmatpush3.msra.mxu1 %v1455_v57 }
 0x13d   :  { %1375 = vmatprep.subr.mxu1 %v1457_v48 }
 0x13e   :  { %1376 = vmatpush3.msra.mxu1 %v1457_v48 }
 0x13f   :  { %1378 = vmatmul.mubr.f32.vlgmr.msra.gmra.mxu1 %v1923_v11  ;;  %v395_v11 = vpop.permute.xlu1 %394 }
 0x140   :  { %1380 = vmatprep.mubr.f32.mxu1 %v1930_v14 }
 0x143   :  { %1381 = vmatmul.mubr.f32.gmra.mxu1 %v1939_v23  ;;  %v405_v32 = vpop.permute.xlu1 %404 }
 0x144   :  { %1383 = vmatprep.mubr.f32.mxu1 %v1946_v26 }
 0x147   :  { %1384 = vmatmul.mubr.f32.gmra.mxu1 %v58_v31 }
 0x148   :  { %1386 = vmatprep.mubr.f32.mxu1 %v59_v34 }
 0x14b   :  { %1387 = vmatmul.mubr.f32.gmra.mxu1 %v60_v27 }
 0x1df   :  { %v1295_v51 = vpop.f32.mrf.mxu1 }
 0x1e0   :  { %v1974_v52 = vadd.f32 %v1295_v51, %v375_v49 }
 0x1e1   :  { %v473_v53 = vpop.f32.mrf.mxu1 }
 0x1e2   :  { %v1976_v54 = vadd.f32 %v473_v53, %v370_v50  ;;  %v516_v55 = vsel %vm512_vm1, %v1974_v52, -inf }
 0x1e3   :  { %517 = vmax.xlane.f32.xlu0 %v516_v55  ;;  %v1298_v62 = vpop.f32.mrf.mxu1 }
 0x1e4   :  { %v1980_v60 = vadd.f32 %v1298_v62, %v385_v56  ;;  %v513_v5 = vsel %vm512_vm1, %v1976_v54, -inf }
 0x1e5   :  { %v483_v2 = vpop.f32.mrf.mxu1 }
 0x1e6   :  { %v1982_v3 = vadd.f32 %v483_v2, %v380_v0  ;;  %v522_v61 = vsel %vm512_vm1, %v1980_v60, -inf }
 0x1e7   :  { %523 = vmax.xlane.f32.xlu1 %v522_v61  ;;  %514 = vmax.xlane.f32.xlu0 %v513_v5  ;;  %v1301_v8 = vpop.f32.mrf.mxu1 }
 0x1e8   :  { %v519_v7 = vsel %vm512_vm1, %v1982_v3, -inf  ;;  %v2006_v14 = vadd.f32 %v1301_v8, %v395_v11 }
 0x1e9   :  { %v493_v58 = vpop.f32.mrf.mxu1 }
 0x1ea   :  { %v1996_v1 = vadd.f32 %v493_v58, %v390_v63  ;;  %v528_v37 = vsel %vm512_vm1, %v2006_v14, -inf }
 0x1eb   :  { %520 = vmax.xlane.f32.xlu1 %v519_v7  ;;  %v1304_v10 = vpop.f32.mrf.mxu1 }
 0x1ec   :  { %v525_v17 = vsel %vm512_vm1, %v1996_v1, -inf  ;;  %v2022_v35 = vadd.f32 %v1304_v10, %v405_v32 }
 0x1ed   :  { %v503_v12 = vpop.f32.mrf.mxu1 }
 0x1ee   :  { %v2014_v36 = vadd.f32 %v503_v12, %v400_v33  ;;  %v534_v41 = vsel %vm512_vm1, %v2022_v35, -inf }
 0x1f0   :  { %v531_v39 = vsel %vm512_vm1, %v2014_v36, -inf }
 0x1ff   :  { %v1379_v13 = vpop.f32.mrf.mxu1 }
 0x200   :  { %v1990_v59 = vadd.f32 %v1379_v13, %v375_v49 }
 0x201   :  { %v869_v15 = vpop.f32.mrf.mxu1 }
 0x202   :  { %v1992_v16 = vadd.f32 %v869_v15, %v370_v50  ;;  %v911_v18 = vsel %vm512_vm1, %v1990_v59, -inf }
 0x203   :  { %v1382_v19 = vpop.f32.mrf.mxu1  ;;  %912 = vmax.xlane.f32.xlu0 %v911_v18 }
 0x204   :  { %v1998_v4 = vadd.f32 %v1382_v19, %v385_v56  ;;  %v908_v20 = vsel %vm512_vm1, %v1992_v16, -inf }
 0x205   :  { %v879_v6 = vpop.f32.mrf.mxu1  ;;  %909 = vmax.xlane.f32.xlu1 %v908_v20 }
 0x206   :  { %v2002_v9 = vadd.f32 %v879_v6, %v380_v0  ;;  %v917_v22 = vsel %vm512_vm1, %v1998_v4, -inf }
 0x207   :  { %v1385_v25 = vpop.f32.mrf.mxu1  ;;  %918 = vmax.xlane.f32.xlu0 %v917_v22 }
 0x208   :  { %v2010_v30 = vadd.f32 %v1385_v25, %v395_v11  ;;  %v914_v23 = vsel %vm512_vm1, %v2002_v9, -inf }
 0x209   :  { %v889_v28 = vpop.f32.mrf.mxu1  ;;  %526 = vmax.xlane.f32.xlu1 %v525_v17 }
 0x20a   :  { %v2018_v38 = vadd.f32 %v889_v28, %v390_v63  ;;  %v923_v31 = vsel %vm512_vm1, %v2010_v30, -inf }
 0x20b   :  { %v1388_v26 = vpop.f32.mrf.mxu1  ;;  %915 = vmax.xlane.f32.xlu0 %v914_v23 }
 0x20c   :  { %v920_v27 = vsel %vm512_vm1, %v2018_v38, -inf  ;;  %v2032_v42 = vadd.f32 %v1388_v26, %v405_v32 }
 0x20d   :  { %529 = vmax.xlane.f32.xlu1 %v528_v37  ;;  %v899_v34 = vpop.f32.mrf.mxu1 }
 0x20e   :  { %v2026_v40 = vadd.f32 %v899_v34, %v400_v33  ;;  %v929_v43 = vsel %vm512_vm1, %v2032_v42, -inf }
 0x20f   :  { %924 = vmax.xlane.f32.xlu0 %v923_v31 }
 0x210   :  { %v926_v29 = vsel %vm512_vm1, %v2026_v40, -inf }
 0x211   :  { %532 = vmax.xlane.f32.xlu1 %v531_v39 }
 0x213   :  { %921 = vmax.xlane.f32.xlu0 %v920_v27 }
 0x215   :  { %535 = vmax.xlane.f32.xlu1 %v534_v41 }
 0x217   :  { %927 = vmax.xlane.f32.xlu0 %v926_v29 }
 0x21b   :  { %930 = vmax.xlane.f32.xlu0 %v929_v43 }
 0x26c   :  { %v518_v44 = vpop.xlane.xlu0 %517 }
 0x26d   :  { %v538_v21 = vsub.f32 %v1974_v52, %v518_v44 }
 0x26f   :  { %v547_v45 = vmul.f32 1.442695, %v538_v21 }
 0x270   :  { %v524_v24 = vpop.xlane.xlu1 %523  ;;  %v515_v46 = vpop.xlane.xlu0 %514 }
 0x271   :  { %1458 = vpow2.f32 %v547_v45  ;;  %v540_v47 = vsub.f32 %v1980_v60, %v524_v24  ;;  %v537_v57 = vsub.f32 %v1976_v54, %v515_v46 }
 0x273   :  { %v545_v48 = vmul.f32 1.442695, %v537_v57  ;;  %v551_v49 = vmul.f32 1.442695, %v540_v47 }
 0x274   :  { %v521_v50 = vpop.xlane.xlu1 %520 }
 0x275   :  { %v539_v51 = vsub.f32 %v1982_v3, %v521_v50  ;;  %1460 = vpow2.f32 %v545_v48 }
 0x276   :  { %1462 = vpow2.f32 %v551_v49 }
 0x277   :  { %v549_v53 = vmul.f32 1.442695, %v539_v51 }
 0x279   :  { %1464 = vpow2.f32 %v549_v53 }
 0x27e   :  { %v2042_v55 = vpop.eup %1458 }
 0x27f   :  { %v564_v52 = vsel %vm512_vm1, %v2042_v55, 0.0 }
 0x280   :  { %565 = vadd.xlane.f32.xlu1 %v564_v52 }
 0x282   :  { %v2046_v56 = vpop.eup %1460 }
 0x283   :  { %v561_v54 = vsel %vm512_vm1, %v2046_v56, 0.0  ;;  %v2050_v62 = vpop.eup %1462 }
 0x284   :  { %562 = vadd.xlane.f32.xlu1 %v561_v54  ;;  %v570_v60 = vsel %vm512_vm1, %v2050_v62, 0.0 }
 0x286   :  { %v2054_v0 = vpop.eup %1464 }
 0x287   :  { %v567_v2 = vsel %vm512_vm1, %v2054_v0, 0.0 }
 0x288   :  { %571 = vadd.xlane.f32.xlu1 %v570_v60 }
 0x28c   :  { %v913_v3 = vpop.xlane.xlu0 %912  ;;  %568 = vadd.xlane.f32.xlu1 %v567_v2 }
 0x28d   :  { %v933_v61 = vsub.f32 %v1990_v59, %v913_v3 }
 0x28e   :  { %v910_v5 = vpop.xlane.xlu1 %909 }
 0x28f   :  { %v942_v7 = vmul.f32 1.442695, %v933_v61  ;;  %v932_v8 = vsub.f32 %v1992_v16, %v910_v5 }
 0x290   :  { %v919_v58 = vpop.xlane.xlu0 %918 }
 0x291   :  { %1466 = vpow2.f32 %v942_v7  ;;  %v940_v10 = vmul.f32 1.442695, %v932_v8  ;;  %v935_v12 = vsub.f32 %v1998_v4, %v919_v58 }
 0x292   :  { %v527_v13 = vpop.xlane.xlu1 %526 }
 0x293   :  { %1468 = vpow2.f32 %v940_v10  ;;  %v946_v15 = vmul.f32 1.442695, %v935_v12  ;;  %v541_v63 = vsub.f32 %v1996_v1, %v527_v13  ;;  %v1522_v10 = vld [vmem:[%s2209_s0 + $0x8] sm:$0xff] }
 0x294   :  { %v916_v18 = vpop.xlane.xlu0 %915 }
 0x295   :  { %v934_v19 = vsub.f32 %v2002_v9, %v916_v18  ;;  %1470 = vpow2.f32 %v946_v15  ;;  %v553_v16 = vmul.f32 1.442695, %v541_v63  ;;  %v1523_v63 = vld [vmem:[%s2209_s0] sm:$0xff] }
 0x296   :  { %v530_v20 = vpop.xlane.xlu1 %529 }
 0x297   :  { %v944_v59 = vmul.f32 1.442695, %v934_v19  ;;  %v542_v6 = vsub.f32 %v2006_v14, %v530_v20 }
 0x298   :  { %v925_v22 = vpop.xlane.xlu0 %924 }
 0x299   :  { %v555_v11 = vmul.f32 1.442695, %v542_v6  ;;  %v937_v25 = vsub.f32 %v2010_v30, %v925_v22  ;;  %1472 = vpow2.f32 %v944_v59  ;;  %v1524_v6 = vld [vmem:[%s2209_s0 + $0x18] sm:$0xff] }
 0x29a   :  { %v533_v4 = vpop.xlane.xlu1 %532 }
 0x29b   :  { %1474 = vpow2.f32 %v555_v11  ;;  %v950_v17 = vmul.f32 1.442695, %v937_v25  ;;  %v543_v28 = vsub.f32 %v2014_v36, %v533_v4  ;;  %v1525_v25 = vld [vmem:[%s2209_s0 + $0x10] sm:$0xff] }
 0x29c   :  { %v922_v23 = vpop.xlane.xlu0 %921  ;;  %1476 = vpow2.f32 %v553_v16 }
 0x29d   :  { %v557_v1 = vmul.f32 1.442695, %v543_v28  ;;  %v936_v9 = vsub.f32 %v2018_v38, %v922_v23  ;;  %1478 = vpow2.f32 %v950_v17 }
 0x29e   :  { %v2067_v33 = vpop.eup %1466  ;;  %v536_v26 = vpop.xlane.xlu1 %535 }
 0x29f   :  { %v948_v14 = vmul.f32 1.442695, %v936_v9  ;;  %v544_v37 = vsub.f32 %v2022_v35, %v536_v26  ;;  %v959_v30 = vsel %vm512_vm1, %v2067_v33, 0.0  ;;  %1480 = vpow2.f32 %v557_v1 }
 0x2a0   :  { %v2072_v31 = vpop.eup %1468  ;;  %960 = vadd.xlane.f32.xlu0 %v959_v30  ;;  %v928_v32 = vpop.xlane.xlu0 %927  ;;  %v1526_v30 = vld [vmem:[%s2209_s0 + $0x48] sm:$0xff] }
 0x2a1   :  { %v559_v36 = vmul.f32 1.442695, %v544_v37  ;;  %v938_v34 = vsub.f32 %v2026_v40, %v928_v32  ;;  %1482 = vpow2.f32 %v948_v14  ;;  %v956_v39 = vsel %vm512_vm1, %v2072_v31, 0.0 }
 0x2a2   :  { %v2077_v27 = vpop.eup %1470 }
 0x2a3   :  { %v952_v38 = vmul.f32 1.442695, %v938_v34  ;;  %1484 = vpow2.f32 %v559_v36  ;;  %v965_v44 = vsel %vm512_vm1, %v2077_v27, 0.0 }
 0x2a4   :  { %957 = vadd.xlane.f32.xlu0 %v956_v39  ;;  %v931_v35 = vpop.xlane.xlu0 %930 }
 0x2a5   :  { %v939_v41 = vsub.f32 %v2032_v42, %v931_v35  ;;  %1486 = vpow2.f32 %v952_v38 }
 0x2a6   :  { %v2080_v29 = vpop.eup %1472 }
 0x2a7   :  { %v954_v43 = vmul.f32 1.442695, %v939_v41  ;;  %v962_v42 = vsel %vm512_vm1, %v2080_v29, 0.0 }
 0x2a8   :  { %v2084_v40 = vpop.eup %1474  ;;  %966 = vadd.xlane.f32.xlu0 %v965_v44 }
 0x2a9   :  { %v576_v21 = vsel %vm512_vm1, %v2084_v40, 0.0  ;;  %v2088_v45 = vpop.eup %1476  ;;  %1488 = vpow2.f32 %v954_v43 }
 0x2aa   :  { %577 = vadd.xlane.f32.xlu1 %v576_v21  ;;  %v2092_v24 = vpop.eup %1478  ;;  %v573_v46 = vsel %vm512_vm1, %v2088_v45, 0.0 }
 0x2ab   :  { %v971_v57 = vsel %vm512_vm1, %v2092_v24, 0.0 }
 0x2ac   :  { %963 = vadd.xlane.f32.xlu0 %v962_v42  ;;  %v2096_v47 = vpop.eup %1480 }
 0x2ad   :  { %v579_v49 = vsel %vm512_vm1, %v2096_v47, 0.0 }
 0x2ae   :  { %574 = vadd.xlane.f32.xlu1 %v573_v46  ;;  %v2100_v48 = vpop.eup %1482 }
 0x2af   :  { %v968_v51 = vsel %vm512_vm1, %v2100_v48, 0.0 }
 0x2b0   :  { %972 = vadd.xlane.f32.xlu0 %v971_v57  ;;  %v2104_v50 = vpop.eup %1484 }
 0x2b1   :  { %v582_v52 = vsel %vm512_vm1, %v2104_v50, 0.0 }
 0x2b2   :  { %580 = vadd.xlane.f32.xlu1 %v579_v49  ;;  %v2108_v53 = vpop.eup %1486 }
 0x2b3   :  { %v974_v54 = vsel %vm512_vm1, %v2108_v53, 0.0 }
 0x2b4   :  { %969 = vadd.xlane.f32.xlu0 %v968_v51 }
 0x2b6   :  { %583 = vadd.xlane.f32.xlu1 %v582_v52  ;;  %v2114_v60 = vpop.eup %1488 }
 0x2b7   :  { %v977_v2 = vsel %vm512_vm1, %v2114_v60, 0.0 }
 0x2b8   :  { %975 = vadd.xlane.f32.xlu0 %v974_v54 }
 0x2bc   :  { %978 = vadd.xlane.f32.xlu0 %v977_v2  ;;  %v1529_v2 = vld [vmem:[%s2209_s0 + $0x28] sm:$0xff] }
 0x309   :  { %v566_v3 = vpop.xlane.xlu1 %565 }
 0x30a   :  { %1490 = vrcp.f32 %v566_v3 }
 0x30d   :  { %v563_v61 = vpop.xlane.xlu1 %562 }
 0x30e   :  { %1492 = vrcp.f32 %v563_v61 }
 0x311   :  { %v572_v5 = vpop.xlane.xlu1 %571 }
 0x312   :  { %1494 = vrcp.f32 %v572_v5 }
 0x315   :  { %v569_v7 = vpop.xlane.xlu1 %568 }
 0x316   :  { %1496 = vrcp.f32 %v569_v7 }
 0x317   :  { %v1491_v8 = vpop.eup %1490 }
 0x318   :  { %v588_v58 = vmul.f32 %v1491_v8, %v2042_v55 }
 0x31a   :  { %v602_v12 = vmul.f32 %v1522_v10, %v588_v58 }
 0x31b   :  { %v1493_v13 = vpop.eup %1492 }
 0x31c   :  { %v612_v15 = vsel %vm512_vm1, %v602_v12, 0.0  ;;  %v586_v18 = vmul.f32 %v1493_v13, %v2046_v56 }
 0x31d   :  { %613 = vadd.xlane.f32.xlu1 %v612_v15 }
 0x31e   :  { %v601_v19 = vmul.f32 %v1523_v63, %v586_v18 }
 0x31f   :  { %v1495_v20 = vpop.eup %1494 }
 0x320   :  { %v609_v59 = vsel %vm512_vm1, %v601_v19, 0.0  ;;  %v592_v55 = vmul.f32 %v1495_v20, %v2050_v62  ;;  %v1532_v19 = vld [vmem:[%s2209_s0 + $0x68] sm:$0xff] }
 0x321   :  { %610 = vadd.xlane.f32.xlu1 %v609_v59 }
 0x322   :  { %v604_v22 = vmul.f32 %v1524_v6, %v592_v55 }
 0x323   :  { %v1497_v16 = vpop.eup %1496 }
 0x324   :  { %v618_v11 = vsel %vm512_vm1, %v604_v22, 0.0  ;;  %v590_v56 = vmul.f32 %v1497_v16, %v2054_v0 }
 0x325   :  { %619 = vadd.xlane.f32.xlu1 %v618_v11 }
 0x326   :  { %v603_v4 = vmul.f32 %v1525_v25, %v590_v56 }
 0x328   :  { %v615_v17 = vsel %vm512_vm1, %v603_v4, 0.0  ;;  %v1534_v4 = vld [vmem:[%s2209_s0 + $0x38] sm:$0xff] }
 0x329   :  { %v961_v62 = vpop.xlane.xlu0 %960  ;;  %616 = vadd.xlane.f32.xlu1 %v615_v17 }
 0x32a   :  { %1498 = vrcp.f32 %v961_v62 }
 0x32d   :  { %v958_v28 = vpop.xlane.xlu0 %957 }
 0x32e   :  { %1500 = vrcp.f32 %v958_v28  ;;  %v1535_v28 = vld [vmem:[%s2209_s0 + $0x70] sm:$0xff] }
 0x331   :  { %v967_v23 = vpop.xlane.xlu0 %966 }
 0x332   :  { %1502 = vrcp.f32 %v967_v23 }
 0x333   :  { %v578_v1 = vpop.xlane.xlu1 %577 }
 0x334   :  { %1504 = vrcp.f32 %v578_v1 }
 0x335   :  { %v964_v9 = vpop.xlane.xlu0 %963 }
 0x336   :  { %1506 = vrcp.f32 %v964_v9 }
 0x337   :  { %v1499_v0 = vpop.eup %1498  ;;  %v575_v26 = vpop.xlane.xlu1 %574 }
 0x338   :  { %1508 = vrcp.f32 %v575_v26  ;;  %v983_v14 = vmul.f32 %v1499_v0, %v2067_v33  ;;  %v1527_v33 = vld [vmem:[%s2209_s0 + $0x40] sm:$0xff]  ;;  %v1537_v26 = vld [vmem:[%s2209_s0 + $0x78] sm:$0xff] }
 0x339   :  { %v973_v37 = vpop.xlane.xlu0 %972 }
 0x33a   :  { %1510 = vrcp.f32 %v973_v37  ;;  %v997_v32 = vmul.f32 %v1526_v30, %v983_v14 }
 0x33b   :  { %v1501_v36 = vpop.eup %1500  ;;  %v581_v34 = vpop.xlane.xlu1 %580 }
 0x33c   :  { %v1007_v38 = vsel %vm512_vm1, %v997_v32, 0.0  ;;  %v981_v39 = vmul.f32 %v1501_v36, %v2072_v31  ;;  %1512 = vrcp.f32 %v581_v34  ;;  %v1528_v31 = vld [vmem:[%s2209_s0 + $0x58] sm:$0xff] }
 0x33d   :  { %1008 = vadd.xlane.f32.xlu0 %v1007_v38  ;;  %v970_v35 = vpop.xlane.xlu0 %969 }
 0x33e   :  { %1514 = vrcp.f32 %v970_v35  ;;  %v996_v41 = vmul.f32 %v1527_v33, %v981_v39 }
 0x33f   :  { %v1503_v43 = vpop.eup %1502  ;;  %v584_v44 = vpop.xlane.xlu1 %583 }
 0x340   :  { %1516 = vrcp.f32 %v584_v44  ;;  %v1004_v21 = vsel %vm512_vm1, %v996_v41, 0.0  ;;  %v987_v42 = vmul.f32 %v1503_v43, %v2077_v27 }
 0x341   :  { %v1505_v46 = vpop.eup %1504  ;;  %1005 = vadd.xlane.f32.xlu0 %v1004_v21  ;;  %v976_v57 = vpop.xlane.xlu0 %975 }
 0x342   :  { %1518 = vrcp.f32 %v976_v57  ;;  %v999_v49 = vmul.f32 %v1528_v31, %v987_v42  ;;  %v596_v51 = vmul.f32 %v1505_v46, %v2084_v40  ;;  %v1530_v40 = vld [vmem:[%s2209_s0 + $0x50] sm:$0xff] }
 0x343   :  { %v1507_v52 = vpop.eup %1506 }
 0x344   :  { %v1013_v54 = vsel %vm512_vm1, %v999_v49, 0.0  ;;  %v606_v3 = vmul.f32 %v1529_v2, %v596_v51  ;;  %v985_v27 = vmul.f32 %v1507_v52, %v2080_v29  ;;  %v1531_v29 = vld [vmem:[%s2209_s0 + $0x20] sm:$0xff] }
 0x345   :  { %v1509_v61 = vpop.eup %1508  ;;  %1014 = vadd.xlane.f32.xlu0 %v1013_v54  ;;  %v979_v5 = vpop.xlane.xlu0 %978 }
 0x346   :  { %1520 = vrcp.f32 %v979_v5  ;;  %v624_v7 = vsel %vm512_vm1, %v606_v3, 0.0  ;;  %v998_v8 = vmul.f32 %v1530_v40, %v985_v27  ;;  %v594_v58 = vmul.f32 %v1509_v61, %v2088_v45 }
 0x347   :  { %v1511_v10 = vpop.eup %1510  ;;  %625 = vadd.xlane.f32.xlu1 %v624_v7 }
 0x348   :  { %v1010_v12 = vsel %vm512_vm1, %v998_v8, 0.0  ;;  %v605_v13 = vmul.f32 %v1531_v29, %v594_v58  ;;  %v991_v15 = vmul.f32 %v1511_v10, %v2092_v24  ;;  %v1533_v24 = vld [vmem:[%s2209_s0 + $0x60] sm:$0xff] }
 0x349   :  { %1011 = vadd.xlane.f32.xlu0 %v1010_v12  ;;  %v1513_v18 = vpop.eup %1512 }
 0x34a   :  { %v621_v63 = vsel %vm512_vm1, %v605_v13, 0.0  ;;  %v1001_v45 = vmul.f32 %v1532_v19, %v991_v15  ;;  %v598_v11 = vmul.f32 %v1513_v18, %v2096_v47  ;;  %v1536_v47 = vld [vmem:[%s2209_s0 + $0x30] sm:$0xff]  ;;  %s1561_s0 = smov [#allocation2]  }
 0x34b   :  { %v1515_v20 = vpop.eup %1514  ;;  %622 = vadd.xlane.f32.xlu1 %v621_v63  ;;  %s1077_s19 = sshll.u32 %s1561_s0, 4  ;;  %s1078_s19 = int_to_ptr.vmem [resolvable:$true] %s1077_s19 }
 0x34c   :  { %v1019_v59 = vsel %vm512_vm1, %v1001_v45, 0.0  ;;  %v989_v55 = vmul.f32 %v1515_v20, %v2100_v48  ;;  %v607_v23 = vmul.f32 %v1536_v47, %v598_v11  ;;  %s1538_s20 = scalar_lea.vmem %s1078_s19, 32  ;;  %p1543_p1 = scmp.lt.s32.totalorder %s1078_s19, %s1078_s19 }
 0x34d   :  { %v1517_v6 = vpop.eup %1516  ;;  %1020 = vadd.xlane.f32.xlu0 %v1019_v59  ;;  %p1539_p0 = scmp.ne.s32.totalorder %s1078_s19, %s1538_s20  ;;  %p1544_p2 = scmp.lt.s32.totalorder %s1538_s20, %s1538_s20 }
 0x34e   :  { %v1000_v22 = vmul.f32 %v1533_v24, %v989_v55  ;;  %v600_v16 = vmul.f32 %v1517_v6, %v2104_v50 }
 0x34f   :  { %v1519_v56 = vpop.eup %1518  ;;  %p1545_p3 = por %p1544_p2, %p1543_p1 }
 0x350   :  { %v1016_v25 = vsel %vm512_vm1, %v1000_v22, 0.0  ;;  %v608_v17 = vmul.f32 %v1534_v4, %v600_v16  ;;  %v993_v48 = vmul.f32 %v1519_v56, %v2108_v53  ;;  %v627_v53 = vsel %vm512_vm1, %v607_v23, 0.0 }
 0x351   :  { %1017 = vadd.xlane.f32.xlu0 %v1016_v25  ;;  %p1546_p4 = pnand %p1545_p3, %p1539_p0 }
 0x352   :  { %v630_v62 = vsel %vm512_vm1, %v608_v17, 0.0  ;;  %v1002_v50 = vmul.f32 %v1535_v28, %v993_v48 }
 0x353   :  { %v1521_v1 = vpop.eup %1520  ;;  %631 = vadd.xlane.f32.xlu1 %v630_v62 }
 0x354   :  { %v1022_v9 = vsel %vm512_vm1, %v1002_v50, 0.0  ;;  %v995_v0 = vmul.f32 %v1521_v1, %v2114_v60 }
 0x355   :  { %1023 = vadd.xlane.f32.xlu0 %v1022_v9 }
 0x356   :  { %v1003_v14 = vmul.f32 %v1537_v26, %v995_v0 }
 0x357   :  { %628 = vadd.xlane.f32.xlu1 %v627_v53 }
 0x358   :  { %v1025_v37 = vsel %vm512_vm1, %v1003_v14, 0.0 }
 0x359   :  { %1026 = vadd.xlane.f32.xlu0 %v1025_v37 }
 0x3a6   :  { %v614_v30 = vpop.xlane.xlu1 %613 }
 0x3aa   :  { %v611_v32 = vpop.xlane.xlu1 %610 }
 0x3ae   :  { %v620_v34 = vpop.xlane.xlu1 %619 }
 0x3b2   :  { %v617_v39 = vpop.xlane.xlu1 %616 }
 0x3c6   :  { %v1009_v36 = vpop.xlane.xlu0 %1008 }
 0x3c7   :  { %v1030_v33 = vsel %vm1028_vm2, %v614_v30, %v1009_v36 }
 0x3ca   :  { %v1006_v38 = vpop.xlane.xlu0 %1005 }
 0x3cb   :  { %v1029_v60 = vsel %vm1028_vm2, %v611_v32, %v1006_v38 }
 0x3cc   :  { %1037 = vxpose.xlu1.b32.start [1/8] (short) (narrow) %v1029_v60, 8 }
 0x3ce   :  { %v1015_v35 = vpop.xlane.xlu0 %1014 }
 0x3cf   :  { %v1032_v42 = vsel %vm1028_vm2, %v620_v34, %v1015_v35 }
 0x3d0   :  { %1038 = vxpose.xlu1.b32.cont [2/8] (short) (narrow) %v1030_v33, 8  ;;  %v626_v41 = vpop.xlane.xlu1 %625 }
 0x3d2   :  { %v1012_v43 = vpop.xlane.xlu0 %1011 }
 0x3d3   :  { %v1031_v44 = vsel %vm1028_vm2, %v617_v39, %v1012_v43 }
 0x3d4   :  { %1039 = vxpose.xlu1.b32.cont [3/8] (short) (narrow) %v1031_v44, 8  ;;  %v623_v46 = vpop.xlane.xlu1 %622 }
 0x3d6   :  { %v1021_v21 = vpop.xlane.xlu0 %1020 }
 0x3d7   :  { %v1034_v52 = vsel %vm1028_vm2, %v626_v41, %v1021_v21 }
 0x3d8   :  { %1040 = vxpose.xlu1.b32.cont [4/8] (short) (narrow) %v1032_v42, 8 }
 0x3da   :  { %v1018_v57 = vpop.xlane.xlu0 %1017 }
 0x3db   :  { %v1033_v31 = vsel %vm1028_vm2, %v623_v46, %v1018_v57 }
 0x3dc   :  { %v632_v49 = vpop.xlane.xlu1 %631  ;;  %1041 = vxpose.xlu1.b32.cont [5/8] (short) (narrow) %v1033_v31, 8 }
 0x3de   :  { %v1024_v51 = vpop.xlane.xlu0 %1023 }
 0x3e0   :  { %v629_v54 = vpop.xlane.xlu1 %628  ;;  %1042 = vxpose.xlu1.b32.cont [6/8] (short) (narrow) %v1034_v52, 8 }
 0x3e1   :  { %v1035_v2 = vsel %vm1028_vm2, %v629_v54, %v1024_v51 }
 0x3e2   :  { %v1027_v3 = vpop.xlane.xlu0 %1026 }
 0x3e3   :  { %v1036_v27 = vsel %vm1028_vm2, %v632_v49, %v1027_v3 }
 0x3e4   :  { %1043 = vxpose.xlu1.b32.cont [7/8] (short) (narrow) %v1035_v2, 8 }
 0x3e8   :  { %1044 = vxpose.xlu1.b32.end [8/8] (short) (narrow) %v1036_v27, 8 }
 0x448   :  { %v1053_v61 = vpop.trf.xlu1 }
 0x449   :  { %1070 = vst.msk [vmem:[#allocation2] sm:$0x3] %vm1069_vm3, %v1053_v61 }
 0x44a   :  { %1549 = shalt.err (!%p1546_p4)
}
 0x44b   :  { %1080 = dma.vmem_to_hbm [thread:$0]  %s1078_s19, 32, %s2214_s5, [#allocation3]  }
 0x44c   :  { %1558 = dma.done.wait [#allocation3], 32  }
 0x44d   :  { %1559 = vsyncadd [#allocation3], 4294967264 }
 0x44e   :  { %1084 = vsyncpa [#allocation3], 1 }

</bundles_post_ra>
